<compile_context>
chip_gen: v6e
topology: v6e:2x2x1
jax: 0.10.0
libtpu: 0.0.40
codegen_flags: <defaults>
</compile_context>

<pallas_src>
import functools

import jax
import jax.numpy as jnp
from jax.experimental import pallas as pl
from jax.experimental.pallas import tpu as pltpu


# --------------------------------------------------------------------------- #
# Kernels (no reshapes, no slices, no concats: 2 matmuls + broadcast add)
# --------------------------------------------------------------------------- #
def _pool_conv_bn_kernel(x_ref, p_ref, w_ref, b_ref, out_ref, *, precision):
    # x_ref block : (1, C_in, S_in)  lane-dense spatial slab (whole pooling bands)
    # p_ref       : (S_in, S_out)    constant block-diagonal 2x2-avg-pool matrix
    # w_ref       : (C_out, C_in)    1x1-conv weight with BN scale folded in
    # b_ref       : (C_out, 1)       folded conv-bias / eval-BN shift (f32)
    pooled = jnp.dot(x_ref[0], p_ref[...], precision=precision,
                     preferred_element_type=jnp.float32)         # (C_in, S_out)
    y = jnp.dot(w_ref[...], pooled.astype(w_ref.dtype), precision=precision,
                preferred_element_type=jnp.float32)              # (C_out, S_out)
    out_ref[0] = (y + b_ref[...]).astype(out_ref.dtype)


def _conv_bn_kernel(x_ref, w_ref, b_ref, out_ref, *, precision):
    # No pooling: 1x1 conv (+ folded shift) on a lane-dense (C_in, hw_t) slab.
    y = jnp.dot(w_ref[...], x_ref[0], precision=precision,
                preferred_element_type=jnp.float32)              # (C_out, hw_t)
    out_ref[0] = (y + b_ref[...]).astype(out_ref.dtype)


# --------------------------------------------------------------------------- #
# Generation-aware budgets / padded-byte accounting / tile pickers
# --------------------------------------------------------------------------- #
def _vmem_capacity():
    try:
        return int(pltpu.get_tpu_info().vmem_capacity_bytes)
    except Exception:
        return 128 << 20                         # assume v5e/v6e-class if unknown


def _gen_budgets():
    """Returns (vmem_limit_cap, per-block byte budget) for this TPU generation."""
    vmem = _vmem_capacity()
    if vmem <= (64 << 20):                       # v7x-class: 64 MiB physical VMEM/TC
        return 44 << 20, 4 << 20
    return 100 << 20, 12 << 20                   # v5e / v6e: 128 MiB physical VMEM


def _padded_bytes(rows, cols, itemsize, sub=8):
    """VMEM footprint of a (rows, cols) tile incl. sublane/lane padding."""
    return (-(-rows // sub) * sub) * (-(-cols // 128) * 128) * itemsize


def _vmem_limit(cap, double_buffered_bytes, resident_bytes):
    need = 2 * double_buffered_bytes + resident_bytes + (8 << 20)
    return int(min(max(need, 32 << 20), cap))


def _pick_s_out(Hp, Wp, C_in, C_out, itemsize, blk_budget, batch):
    """Output-chunk size (flat pooled pixels) per grid step for the pooled path.

    Constraints: whole pooling bands (S_out % Wp == 0), exact divisor of the
    pooled map (keeps the block-diagonal pool matmul free of OOB garbage), and
    lane-aligned (S_out % 128 == 0) unless it is the full extent.
    """
    total = Hp * Wp
    sub = 32 // itemsize
    pmat_cap = max(blk_budget, 4 << 20)

    def fits(s):
        s_in = 4 * s
        blk = (_padded_bytes(C_in, s_in, itemsize, sub)
               + _padded_bytes(C_out, s, itemsize, sub))
        return blk <= blk_budget and _padded_bytes(s_in, s, itemsize, sub) <= pmat_cap

    cands = [s for s in range(Wp, total, Wp) if total % s == 0 and s % 128 == 0]
    cands.append(total)                                   # full extent always legal
    fitting = [s for s in cands if fits(s)] or [min(cands)]
    s_out = max(fitting)
    if batch == 1:                    # v7x megacore: keep >= 2 grid steps if possible
        multi = [s for s in fitting if total // s >= 2]
        if multi:
            s_out = max(multi)
    return s_out


def _pick_hw_tile(HW, C_in, C_out, itemsize, blk_budget, batch):
    """Spatial tile for the no-pool path (ragged last block via pl.cdiv is safe)."""
    sub = 32 // itemsize

    def blk_bytes(t):
        return (_padded_bytes(C_in, t, itemsize, sub)
                + _padded_bytes(C_out, t, itemsize, sub))

    cands = list(range(128, HW, 128))
    cands.append(HW)                                      # full extent always legal
    fitting = [t for t in cands if blk_bytes(t) <= blk_budget] or [cands[0]]
    t = max(fitting)
    if batch == 1:
        multi = [c for c in fitting if pl.cdiv(HW, c) >= 2]
        if multi:
            t = max(multi)
    return t


# --------------------------------------------------------------------------- #
# Constant operands
# --------------------------------------------------------------------------- #
def _fold_affine(params, C_out, shortcut_norm):
    """Fold conv bias + eval-BN into per-channel (scale, shift), both f32."""
    bias = params.get("b")
    if bias is None:
        bias = jnp.zeros((C_out,), jnp.float32)
    bias = bias.astype(jnp.float32)
    if shortcut_norm:
        eps = jnp.float32(1e-5)
        inv_std = params["bn_gamma"].astype(jnp.float32) / jnp.sqrt(
            params["bn_rvar"].astype(jnp.float32) + eps)
        scale = inv_std
        shift = inv_std * (bias - params["bn_rmean"].astype(jnp.float32)) \
            + params["bn_beta"].astype(jnp.float32)
    else:
        scale = jnp.ones((C_out,), jnp.float32)
        shift = bias
    return scale.reshape(C_out, 1), shift.reshape(C_out, 1)


def _pool_matrix(s_in, s_out, W, Wp, dtype):
    """(S_in, S_out) block-diagonal 2x2-average-pool matrix (1/4 folded in).

    Input flat index j (row-major within a chunk of whole pooling bands) maps to
    band j // (2W) and image column (j % (2W)) % W; output flat index p maps to
    band p // Wp and pooled column p % Wp.
    """
    j = jnp.arange(s_in)
    p = jnp.arange(s_out)
    band_j = j // (2 * W)
    col_j = (j % (2 * W)) % W
    band_p = p // Wp
    wp = p % Wp
    m = (band_j[:, None] == band_p[None, :]) & ((col_j[:, None] // 2) == wp[None, :])
    return (0.25 * m.astype(jnp.float32)).astype(dtype)


# --------------------------------------------------------------------------- #
# Wrapper
# --------------------------------------------------------------------------- #
def projection_shortcut(x, params, *, do_pool=True, pool_factor=2,
                        shortcut_norm=True, precision=None):
    """x: (B, C_in, H, W) NCHW (f32 or bf16).  params['w']: (C_out, C_in, 1, 1)."""
    B, C_in, H, W = x.shape
    C_out = params["w"].shape[0]

    # Identity branch of the module (in_dim == out_dim and no pooling).
    if (C_in == C_out) and not do_pool:
        return x

    cdtype = x.dtype                                # matmul operand dtype
    itemsize = jnp.dtype(cdtype).itemsize
    if precision is None:
        # HIGHEST keeps near-f32 parity with the torch reference; on v5e, if the
        # kernel ever profiles MXU-bound, pass Precision.DEFAULT (or feed bf16).
        precision = (jax.lax.Precision.HIGHEST if cdtype == jnp.float32
                     else jax.lax.Precision.DEFAULT)

    # Fold conv bias + eval-BN into (scale, shift); fold the scale into w.
    w2 = params["w"].reshape(C_out, C_in).astype(jnp.float32)
    scale, shift = _fold_affine(params, C_out, shortcut_norm)
    w_folded = (scale * w2).astype(cdtype)          # (C_out, C_in)
    shift = shift.astype(jnp.float32)               # (C_out, 1), added in f32

    cap, blk_budget = _gen_budgets()
    sub = 32 // itemsize
    w_blk = _padded_bytes(C_out, C_in, itemsize, sub)

    if do_pool:
        if pool_factor != 2 or H % 2 or W % 2:
            raise NotImplementedError("only 2x2 average pooling is implemented")
        Hp, Wp = H // 2, W // 2
        HW, HWp = H * W, Hp * Wp

        xf = x.reshape(B, C_in, HW)                 # free, lane-dense view
        s_out = _pick_s_out(Hp, Wp, C_in, C_out, itemsize, blk_budget, B)
        s_in = 4 * s_out
        n_t = HWp // s_out
        pmat = _pool_matrix(s_in, s_out, W, Wp, cdtype)

        x_blk = _padded_bytes(C_in, s_in, itemsize, sub)
        o_blk = _padded_bytes(C_out, s_out, itemsize, sub)
        p_blk = _padded_bytes(s_in, s_out, itemsize, sub)
        tmp = _padded_bytes(C_in, s_out, 4) + _padded_bytes(C_out, s_out, 4)
        vlim = _vmem_limit(cap, x_blk + o_blk + p_blk, w_blk + tmp)

        out_flat = pl.pallas_call(
            functools.partial(_pool_conv_bn_kernel, precision=precision),
            out_shape=jax.ShapeDtypeStruct((B, C_out, HWp), x.dtype),
            grid=(B, n_t),
            in_specs=[
                pl.BlockSpec((1, C_in, s_in), lambda b, t: (b, 0, t)),
                pl.BlockSpec((s_in, s_out), lambda b, t: (0, 0)),
                pl.BlockSpec((C_out, C_in), lambda b, t: (0, 0)),
                pl.BlockSpec((C_out, 1), lambda b, t: (0, 0)),
            ],
            out_specs=pl.BlockSpec((1, C_out, s_out), lambda b, t: (b, 0, t)),
            compiler_params=pltpu.CompilerParams(
                dimension_semantics=("parallel", "parallel"),
                vmem_limit_bytes=vlim),
        )(xf, pmat, w_folded, shift)
        return out_flat.reshape(B, C_out, Hp, Wp)

    # No pooling but in_dim != out_dim: 1x1 conv (+ optional BN) at full res.
    HW = H * W
    xf = x.reshape(B, C_in, HW)                     # free, lane-dense view
    hw_t = _pick_hw_tile(HW, C_in, C_out, itemsize, blk_budget, B)
    n_s = pl.cdiv(HW, hw_t)                         # ragged last block is masked

    x_blk = _padded_bytes(C_in, hw_t, itemsize, sub)
    o_blk = _padded_bytes(C_out, hw_t, itemsize, sub)
    tmp = _padded_bytes(C_out, hw_t, 4)
    vlim = _vmem_limit(cap, x_blk + o_blk, w_blk + tmp)

    out_flat = pl.pallas_call(
        functools.partial(_conv_bn_kernel, precision=precision),
        out_shape=jax.ShapeDtypeStruct((B, C_out, HW), x.dtype),
        grid=(B, n_s),
        in_specs=[
            pl.BlockSpec((1, C_in, hw_t), lambda b, s: (b, 0, s)),
            pl.BlockSpec((C_out, C_in), lambda b, s: (0, 0)),
            pl.BlockSpec((C_out, 1), lambda b, s: (0, 0)),
        ],
        out_specs=pl.BlockSpec((1, C_out, hw_t), lambda b, s: (b, 0, s)),
        compiler_params=pltpu.CompilerParams(
            dimension_semantics=("parallel", "parallel"),
            vmem_limit_bytes=vlim),
    )(xf, w_folded, shift)
    return out_flat.reshape(B, C_out, H, W)


# --------------------------------------------------------------------------- #
# Pure-JAX reference (matches the PyTorch forward, eval-mode BN)
# --------------------------------------------------------------------------- #
def projection_shortcut_reference(x, params, *, do_pool=True, shortcut_norm=True):
    B, C_in, H, W = x.shape
    C_out = params["w"].shape[0]
    if (C_in == C_out) and not do_pool:
        return x
    y = x.astype(jnp.float32)
    if do_pool:
        y = y.reshape(B, C_in, H // 2, 2, W // 2, 2).mean(axis=(3, 5))
    y = jax.lax.conv_general_dilated(
        y, params["w"], (1, 1), "VALID",
        dimension_numbers=("NCHW", "OIHW", "NCHW"),
        precision=jax.lax.Precision.HIGHEST)
    y = y + params["b"][None, :, None, None]
    if shortcut_norm:
        eps = 1e-5
        y = (y - params["bn_rmean"][None, :, None, None]) / jnp.sqrt(
            params["bn_rvar"][None, :, None, None] + eps)
        y = y * params["bn_gamma"][None, :, None, None] \
            + params["bn_beta"][None, :, None, None]
    return y


def make_params(key, C_in, C_out):
    ks = jax.random.split(key, 6)
    return {
        # Conv2d(in_dim, out_dim, kernel_size=1)
        "w": 0.1 * jax.random.normal(ks[0], (C_out, C_in, 1, 1), jnp.float32),
        "b": 0.1 * jax.random.normal(ks[1], (C_out,), jnp.float32),
        # BatchNorm2d(out_dim), eval mode (running stats)
        "bn_gamma": 1.0 + 0.1 * jax.random.normal(ks[2], (C_out,), jnp.float32),
        "bn_beta": 0.1 * jax.random.normal(ks[3], (C_out,), jnp.float32),
        "bn_rmean": 0.1 * jax.random.normal(ks[4], (C_out,), jnp.float32),
        "bn_rvar": jax.random.uniform(ks[5], (C_out,), jnp.float32, 0.5, 1.5),
    }


if __name__ == "__main__":
    key = jax.random.PRNGKey(0)
    kx, kp = jax.random.split(key)
    B, C_in, C_out, H, W = 2, 16, 32, 16, 16
    x = jax.random.normal(kx, (B, C_in, H, W), jnp.float32)
    params = make_params(kp, C_in, C_out)

    # Main path (f32): AvgPool2d(2) -> Conv2d 1x1 -> BatchNorm2d (eval), fused.
    fwd = jax.jit(functools.partial(projection_shortcut, params=params,
                                    do_pool=True, shortcut_norm=True))
    out = jax.block_until_ready(fwd(x))
    ref = projection_shortcut_reference(x, params, do_pool=True,
                                        shortcut_norm=True)
    err = float(jnp.max(jnp.abs(out - ref)))
    if out.shape != (B, C_out, H // 2, W // 2) or not bool(
            jnp.allclose(out, ref, rtol=1e-4, atol=1e-4)):
        raise AssertionError(f"pooled path mismatch, max abs err = {err}")

    # No-pool projection (in_dim != out_dim, do_pool=False): conv 1x1 + BN.
    fwd2 = jax.jit(functools.partial(projection_shortcut, params=params,
                                     do_pool=False, shortcut_norm=True))
    out2 = jax.block_until_ready(fwd2(x))
    ref2 = projection_shortcut_reference(x, params, do_pool=False,
                                         shortcut_norm=True)
    err2 = float(jnp.max(jnp.abs(out2 - ref2)))
    if not bool(jnp.allclose(out2, ref2, rtol=1e-4, atol=1e-4)):
        raise AssertionError(f"no-pool path mismatch, max abs err = {err2}")

    # Identity branch (in_dim == out_dim, no pooling) returns x unchanged.
    params_id = make_params(kp, C_in, C_in)
    out3 = projection_shortcut(x, params_id, do_pool=False, shortcut_norm=True)
    if out3.shape != x.shape or not bool(jnp.all(out3 == x)):
        raise AssertionError("identity branch mismatch")

    # bf16 activations end-to-end (f32 accumulation inside the kernel).
    xb = x.astype(jnp.bfloat16)
    fwd_b = jax.jit(functools.partial(projection_shortcut, params=params,
                                      do_pool=True, shortcut_norm=True))
    outb = jax.block_until_ready(fwd_b(xb))
    refb = projection_shortcut_reference(xb.astype(jnp.float32), params,
                                         do_pool=True, shortcut_norm=True)
    errb = float(jnp.max(jnp.abs(outb.astype(jnp.float32) - refb)))
    if outb.dtype != jnp.bfloat16 or not bool(
            jnp.allclose(outb.astype(jnp.float32), refb, rtol=5e-2, atol=5e-2)):
        raise AssertionError(f"bf16 path mismatch, max abs err = {errb}")

    print("KERNEL_OK")
</pallas_src>

<mosaic_0001>
module attributes {stable_mosaic.version = 11 : i64} {
  func.func @_pool_conv_bn_kernel(%arg0: i32, %arg1: i32, %arg2: memref<1x16x256xf32, #tpu.memory_space<vmem>>, %arg3: memref<256x64xf32, #tpu.memory_space<vmem>>, %arg4: memref<32x16xf32, #tpu.memory_space<vmem>>, %arg5: memref<32x1xf32, #tpu.memory_space<vmem>>, %arg6: memref<1x32x64xf32, #tpu.memory_space<vmem>>) attributes {dimension_semantics = [#tpu.dimension_semantics<parallel>, #tpu.dimension_semantics<parallel>], iteration_bounds = array<i64: 2, 1>, scalar_prefetch = 0 : i64, scratch_operands = 0 : i64, tpu.core_type = #tpu.core_type<tc>, window_params = [{transform_indices = @transform_0, window_bounds = array<i64: 1, 16, 256>}, {pipeline_mode = #tpu.pipeline_mode<synchronous>, transform_indices = @transform_1, window_bounds = array<i64: 256, 64>}, {pipeline_mode = #tpu.pipeline_mode<synchronous>, transform_indices = @transform_2, window_bounds = array<i64: 32, 16>}, {pipeline_mode = #tpu.pipeline_mode<synchronous>, transform_indices = @transform_3, window_bounds = array<i64: 32, 1>}, {transform_indices = @transform_4, window_bounds = array<i64: 1, 32, 64>}]} {
    %c0 = arith.constant 0 : index
    %c0_0 = arith.constant 0 : index
    %c0_1 = arith.constant 0 : index
    %0 = vector.load %arg2[%c0, %c0_0, %c0_1] : memref<1x16x256xf32, #tpu.memory_space<vmem>>, vector<1x16x256xf32>
    %1 = vector.shape_cast %0 : vector<1x16x256xf32> to vector<16x256xf32>
    %c0_2 = arith.constant 0 : index
    %c0_3 = arith.constant 0 : index
    %2 = vector.load %arg3[%c0_2, %c0_3] : memref<256x64xf32, #tpu.memory_space<vmem>>, vector<256x64xf32>
    %cst = arith.constant dense<0.000000e+00> : vector<16x64xf32>
    %3 = tpu.matmul %1, %2, %cst {dimension_numbers = #tpu.dot_dimension_numbers<[1], [0], [0], [1], [0, 0, 1, 1], [], []>, precision = #tpu.contract_precision<fp32>} : vector<16x256xf32>, vector<256x64xf32>, vector<16x64xf32> -> vector<16x64xf32>
    %c0_4 = arith.constant 0 : index
    %c0_5 = arith.constant 0 : index
    %4 = vector.load %arg4[%c0_4, %c0_5] : memref<32x16xf32, #tpu.memory_space<vmem>>, vector<32x16xf32>
    %cst_6 = arith.constant dense<0.000000e+00> : vector<32x64xf32>
    %5 = tpu.matmul %4, %3, %cst_6 {dimension_numbers = #tpu.dot_dimension_numbers<[1], [0], [0], [1], [0, 0, 1, 1], [], []>, precision = #tpu.contract_precision<fp32>} : vector<32x16xf32>, vector<16x64xf32>, vector<32x64xf32> -> vector<32x64xf32>
    %c0_7 = arith.constant 0 : index
    %c0_8 = arith.constant 0 : index
    %6 = vector.load %arg5[%c0_7, %c0_8] : memref<32x1xf32, #tpu.memory_space<vmem>>, vector<32x1xf32>
    %7 = vector.broadcast %6 : vector<32x1xf32> to vector<32x64xf32>
    %8 = arith.addf %5, %7 : vector<32x64xf32>
    %c0_9 = arith.constant 0 : index
    %c0_10 = arith.constant 0 : index
    %c0_11 = arith.constant 0 : index
    %9 = vector.load %arg6[%c0_9, %c0_10, %c0_11] : memref<1x32x64xf32, #tpu.memory_space<vmem>>, vector<1x32x64xf32>
    %10 = vector.shape_cast %9 : vector<1x32x64xf32> to vector<32x64xf32>
    %11 = vector.shape_cast %8 : vector<32x64xf32> to vector<1x32x64xf32>
    tpu.vector_store %arg6[%c0_9, %c0_10, %c0_11], %11 {strides = array<i32>} : memref<1x32x64xf32, #tpu.memory_space<vmem>>, vector<1x32x64xf32>,
    return
  }
  func.func @transform_0(%arg0: i32, %arg1: i32) -> (i32, i32, i32) {
    %c0_i32 = arith.constant 0 : i32
    %c0_i32_0 = arith.constant 0 : i32
    return %arg0, %c0_i32, %arg1 : i32, i32, i32
  }
  func.func @transform_1(%arg0: i32, %arg1: i32) -> (i32, i32) {
    %c0_i32 = arith.constant 0 : i32
    %c0_i32_0 = arith.constant 0 : i32
    %c0_i32_1 = arith.constant 0 : i32
    return %c0_i32, %c0_i32_0 : i32, i32
  }
  func.func @transform_2(%arg0: i32, %arg1: i32) -> (i32, i32) {
    %c0_i32 = arith.constant 0 : i32
    %c0_i32_0 = arith.constant 0 : i32
    %c0_i32_1 = arith.constant 0 : i32
    return %c0_i32, %c0_i32_0 : i32, i32
  }
  func.func @transform_3(%arg0: i32, %arg1: i32) -> (i32, i32) {
    %c0_i32 = arith.constant 0 : i32
    %c0_i32_0 = arith.constant 0 : i32
    %c0_i32_1 = arith.constant 0 : i32
    return %c0_i32, %c0_i32_0 : i32, i32
  }
  func.func @transform_4(%arg0: i32, %arg1: i32) -> (i32, i32, i32) {
    %c0_i32 = arith.constant 0 : i32
    %c0_i32_0 = arith.constant 0 : i32
    return %arg0, %c0_i32, %arg1 : i32, i32, i32
  }
}

</mosaic_0001>

<bundles_post_ra>
// kernel: projection_shortcut.1
= control target key start
LH: loop header
LB: loop body
LE: loop exit
PB: predicated region body
PF: predicated region fallthrough
CT: control target
= control target key end

     0   :  { %s2319_s15 = smov 0   ;;  %s2321_s16 = smov 0   ;;  %s3179_s0 = inlined_call_operand.vmem [shape: f32[2,16,256], index: 0, kind: input, shape index: {}]   ;;  %s3180_s1 = inlined_call_operand.vmem [shape: f32[256,64], index: 1, kind: input, shape index: {}]   ;;  %s3181_s2 = inlined_call_operand.vmem [shape: f32[32,16], index: 2, kind: input, shape index: {}]   ;;  %s3182_s3 = inlined_call_operand.vmem [shape: f32[32,1], index: 3, kind: input, shape index: {}]   ;;  %s3183_s4 = inlined_call_operand.vmem [shape: f32[2,32,64], index: 4, kind: output, shape index: {}]  }
   0x1   :  { %s2323_s17 = smov 0  }
   0x2 LB: > { %s26_s18 = sadd.s32 1, %s2287_s16  ;;  %p1909_p0 = scmp.ge.s32.totalorder %s2291_s17, 1  ;;  %s2291_s17 = sphi %s2323_s17, %s14_s17   ;;  %s2287_s16 = sphi %s2321_s16, %s3361_s16   ;;  %s2283_s15 = sphi %s2319_s15, %s3360_s15  }
   0x3   : > { %p28_p1 = scmp.ge.s32.totalorder %s26_s18, 2  ;;  %p183_p2 = scmp.lt.s32.totalorder %s2291_s17, 3 }
   0x5   : > { %s3363_s18 = smov (%p28_p1, %s26_s18), 0  ;;  %p184_p3 = pnand %p1909_p0, %p183_p2 }
   0x7   : > { %187 = sbr.rel (%p184_p3) target bundleno = 570 (0x23a), region = 36 }
   0xc   : > { %v269_v0 = vld [vmem:[%s3180_s1 + $0xf8] sm:$0xff]  ;;  %v268_v2 = vld [vmem:[%s3180_s1 + $0xf0] sm:$0xff]  ;;  %v267_v7 = vld [vmem:[%s3180_s1 + $0xe8] sm:$0xff]  ;;  %p217_p4 = scmp.lt.s32.totalorder %s2283_s15, 1  ;;  %vm1216_vm0 = vcmask 130048   ;;  %vm1817_vm1 = vcmask 523264  }
   0xd   : > { %v253_v1 = vld [vmem:[%s3180_s1 + $0x78] sm:$0xff]  ;;  %v2348_v3 = vand.u32 4294901760, %v269_v0  ;;  %v2352_v5 = vand.u32 4294901760, %v268_v2  ;;  %v252_v6 = vld [vmem:[%s3180_s1 + $0x70] sm:$0xff]  ;;  %v251_v8 = vld [vmem:[%s3180_s1 + $0x68] sm:$0xff]  ;;  %v2365_v10 = vand.u32 4294901760, %v267_v7 }
   0xe   : > { %v2350_v4 = vand.u32 4294901760, %v253_v1  ;;  %v2363_v9 = vand.u32 4294901760, %v252_v6  ;;  %v2367_v11 = vand.u32 4294901760, %v251_v8  ;;  %v266_v12 = vld [vmem:[%s3180_s1 + $0xe0] sm:$0xff]  ;;  %v265_v14 = vld [vmem:[%s3180_s1 + $0xd8] sm:$0xff]  ;;  %v2396_v20 = vld [vmem:[%s3180_s1 + $0xd0] sm:$0xff] }
   0xf   : > { %v250_v13 = vld [vmem:[%s3180_s1 + $0x60] sm:$0xff]  ;;  %1918 = vmatprep.subr.mxu0 %v2348_v3  ;;  %v2379_v15 = vand.u32 4294901760, %v266_v12  ;;  %v2383_v17 = vand.u32 4294901760, %v265_v14  ;;  %v2386_v18 = vsub.f32 %v269_v0, %v2348_v3  ;;  %v2391_v19 = vld [vmem:[%s3180_s1 + $0x58] sm:$0xff]  ;;  %v2401_v21 = vld [vmem:[%s3180_s1 + $0x50] sm:$0xff]  ;;  %v2411_v24 = vand.u32 4294901760, %v2396_v20 }
  0x10   : > { %v2381_v16 = vand.u32 4294901760, %v250_v13  ;;  %1919 = vmatpush3.msra.mxu0 %v2350_v4  ;;  %v2405_v22 = vand.u32 4294901760, %v2391_v19  ;;  %v2408_v23 = vsub.f32 %v253_v1, %v2350_v4  ;;  %v2414_v25 = vsub.f32 %v268_v2, %v2352_v5  ;;  %v2419_v26 = vld [vmem:[%s3180_s1 + $0xc8] sm:$0xff]  ;;  %v2429_v28 = vld [vmem:[%s3180_s1 + $0xc0] sm:$0xff]  ;;  %v2481_v46 = vld [vmem:[%s3180_s1 + $0xb8] sm:$0xff]  ;;  %s3365_s15 = smov (!%p217_p4, %s2283_s15), 1 }
  0x11   : > { %3259 = vst [vmem:[#allocation2_spill] sm:$0xff] %v2411_v24  ;;  %v2424_v27 = vld [vmem:[%s3180_s1 + $0x48] sm:$0xff]  ;;  %1920 = vmatprep.subr.mxu0 %v2352_v5  ;;  %v3197_v29 = vand.u32 4294901760, %v2386_v18  ;;  %v2434_v30 = vand.u32 4294901760, %v2401_v21  ;;  %v2437_v31 = vsub.f32 %v252_v6, %v2363_v9  ;;  %v2440_v32 = vand.u32 4294901760, %v2419_v26  ;;  %v2454_v37 = vld [vmem:[%s3180_s1 + $0x40] sm:$0xff] }
  0x12   : > { %1921 = vmatpush3.msra.mxu0 %v2363_v9  ;;  %v3196_v33 = vand.u32 4294901760, %v2408_v23  ;;  %v3194_v34 = vand.u32 4294901760, %v2414_v25  ;;  %v2446_v35 = vsub.f32 %v267_v7, %v2365_v10  ;;  %v2449_v36 = vand.u32 4294901760, %v2424_v27  ;;  %v2494_v51 = vld [vmem:[%s3180_s1 + $0x38] sm:$0xff]  ;;  %v2504_v56 = vld [vmem:[%s3180_s1 + $0xb0] sm:$0xff]  ;;  %v2534_v2 = vld [vmem:[%s3180_s1 + $0xa8] sm:$0xff] }
  0x13   : > { %3260 = vst [vmem:[#allocation3_spill] sm:$0xff] %v2434_v30  ;;  %3261 = vst [vmem:[#allocation4_spill] sm:$0xff] %v2440_v32  ;;  %1922 = vmatprep.subr.mxu0 %v2365_v10  ;;  %v513_v38 = vsub.f32 %v2386_v18, %v3197_v29  ;;  %v3193_v39 = vand.u32 4294901760, %v2437_v31  ;;  %v2462_v40 = vsub.f32 %v251_v8, %v2367_v11  ;;  %v2465_v41 = vand.u32 4294901760, %v2429_v28  ;;  %v2519_v61 = vld [vmem:[%s3180_s1 + $0x30] sm:$0xff]  ;;  %s1916_s7 = sshll.u32 %s3365_s15, 5 }
  0x14   : > { %3262 = vst [vmem:[#allocation5_spill] sm:$0xff] %v2449_v36  ;;  %1923 = vmatpush3.msra.mxu0 %v2367_v11  ;;  %v401_v42 = vsub.f32 %v2408_v23, %v3196_v33  ;;  %v520_v43 = vsub.f32 %v2414_v25, %v3194_v34  ;;  %v3191_v44 = vand.u32 4294901760, %v2446_v35  ;;  %v2476_v45 = vsub.f32 %v266_v12, %v2379_v15  ;;  %v2676_v33 = vld [vmem:[%s3180_s1 + $0x88] sm:$0xff]  ;;  %s2726_s14 = scalar_lea.vmem %s3179_s0, %s1916_s7 }
  0x15   : > { %3263 = vst [vmem:[#allocation6_spill] sm:$0xff] %v2465_v41  ;;  %1924 = vmatprep.subr.mxu0 %v2379_v15  ;;  %v514_v47 = vand.u32 4294901760, %v513_v38  ;;  %v408_v48 = vsub.f32 %v2437_v31, %v3193_v39  ;;  %v3189_v49 = vand.u32 4294901760, %v2462_v40  ;;  %v2489_v50 = vand.u32 4294901760, %v2454_v37 }
  0x16   : > { %1925 = vmatpush3.msra.mxu0 %v2381_v16  ;;  %v402_v52 = vand.u32 4294901760, %v401_v42  ;;  %v521_v53 = vand.u32 4294901760, %v520_v43  ;;  %v527_v54 = vsub.f32 %v2446_v35, %v3191_v44  ;;  %v3188_v55 = vand.u32 4294901760, %v2476_v45  ;;  %v2649_v44 = vld [vmem:[%s3180_s1 + $0x90] sm:$0xff] }
  0x17   : > { %3264 = vst [vmem:[#allocation7_spill] sm:$0xff] %v2489_v50  ;;  %1926 = vmatprep.subr.mxu0 %v2383_v17  ;;  %1956 = vmatprep.subr.mxu1 %v514_v47  ;;  %v409_v57 = vand.u32 4294901760, %v408_v48  ;;  %v415_v58 = vsub.f32 %v2462_v40, %v3189_v49  ;;  %v2511_v59 = vsub.f32 %v250_v13, %v2381_v16  ;;  %v2514_v60 = vand.u32 4294901760, %v2481_v46  ;;  %v2548_v13 = vld [vmem:[%s3180_s1 + $0x28] sm:$0xff]  ;;  %v2633_v49 = vld [vmem:[%s3180_s1 + $0x18] sm:$0xff] }
  0x18   : > { %1927 = vmatpush3.msra.mxu0 %v2405_v22  ;;  %1957 = vmatpush3.msra.mxu1 %v402_v52  ;;  %v528_v62 = vand.u32 4294901760, %v527_v54  ;;  %v534_v63 = vsub.f32 %v2476_v45, %v3188_v55  ;;  %v2526_v0 = vsub.f32 %v265_v14, %v2383_v17  ;;  %v2529_v1 = vand.u32 4294901760, %v2494_v51  ;;  %v2575_v52 = vld [vmem:[%s3180_s1 + $0xa0] sm:$0xff] }
  0x19   : > { %3265 = vst [vmem:[#allocation8_spill] sm:$0xff] %v2514_v60  ;;  %1928 = vmatprep.subr.mxu0 %v2411_v24  ;;  %1958 = vmatprep.subr.mxu1 %v521_v53  ;;  %v416_v6 = vand.u32 4294901760, %v415_v58  ;;  %v3187_v7 = vand.u32 4294901760, %v2511_v59  ;;  %v2540_v8 = vsub.f32 %v2391_v19, %v2405_v22  ;;  %v2543_v12 = vand.u32 4294901760, %v2504_v56 }
  0x1a   : > { %3266 = vst [vmem:[#allocation9_spill] sm:$0xff] %v2529_v1  ;;  %1929 = vmatpush3.msra.mxu0 %v2434_v30  ;;  %1959 = vmatpush3.msra.mxu1 %v409_v57  ;;  %v535_v14 = vand.u32 4294901760, %v534_v63  ;;  %v3184_v38 = vand.u32 4294901760, %v2526_v0  ;;  %v2554_v42 = vsub.f32 %v2396_v20, %v2411_v24  ;;  %v2557_v19 = vand.u32 4294901760, %v2519_v61 }
  0x1b   : > { %3267 = vst [vmem:[#allocation10_spill] sm:$0xff] %v2543_v12  ;;  %1930 = vmatprep.subr.mxu0 %v2440_v32  ;;  %1960 = vmatprep.subr.mxu1 %v528_v62  ;;  %v422_v43 = vsub.f32 %v2511_v59, %v3187_v7  ;;  %v3185_v47 = vand.u32 4294901760, %v2540_v8  ;;  %v2567_v48 = vsub.f32 %v2401_v21, %v2434_v30  ;;  %v2570_v20 = vand.u32 4294901760, %v2534_v2 }
  0x1c   : > { %3268 = vst [vmem:[#allocation11_spill] sm:$0xff] %v2557_v19  ;;  %1931 = vmatpush3.msra.mxu0 %v2449_v36  ;;  %1961 = vmatpush3.msra.mxu1 %v416_v6  ;;  %v541_v53 = vsub.f32 %v2526_v0, %v3184_v38  ;;  %v3186_v54 = vand.u32 4294901760, %v2554_v42  ;;  %v2584_v21 = vsub.f32 %v2419_v26, %v2440_v32  ;;  %v2587_v57 = vand.u32 4294901760, %v2548_v13  ;;  %v2601_v26 = vld [vmem:[%s3180_s1 + $0x20] sm:$0xff] }
  0x1d   : > { %3269 = vst [vmem:[#allocation12_spill] sm:$0xff] %v2570_v20  ;;  %1932 = vmatprep.subr.mxu0 %v2465_v41  ;;  %1962 = vmatprep.subr.mxu1 %v535_v14  ;;  %v423_v58 = vand.u32 4294901760, %v422_v43  ;;  %v429_v62 = vsub.f32 %v2540_v8, %v3185_v47  ;;  %v3190_v63 = vand.u32 4294901760, %v2567_v48  ;;  %v2596_v6 = vsub.f32 %v2424_v27, %v2449_v36  ;;  %v2614_v27 = vld [vmem:[%s3180_s1 + $0x98] sm:$0xff] }
  0x1e   : > { %3270 = vst [vmem:[#allocation13_spill] sm:$0xff] %v2587_v57  ;;  %1933 = vmatpush3.msra.mxu0 %v2489_v50  ;;  %v542_v38 = vand.u32 4294901760, %v541_v53  ;;  %v548_v14 = vsub.f32 %v2554_v42, %v3186_v54  ;;  %v3192_v43 = vand.u32 4294901760, %v2584_v21  ;;  %v2609_v47 = vand.u32 4294901760, %v2575_v52 }
  0x1f   : > { %1963 = vmatpush3.msra.mxu1 %v423_v58  ;;  %1934 = vmatprep.subr.mxu0 %v2514_v60  ;;  %v430_v53 = vand.u32 4294901760, %v429_v62  ;;  %v436_v54 = vsub.f32 %v2567_v48, %v3190_v63  ;;  %v3195_v7 = vand.u32 4294901760, %v2596_v6  ;;  %v2628_v55 = vsub.f32 %v2429_v28, %v2465_v41 }
  0x20   : > { %3271 = vst [vmem:[#allocation14_spill] sm:$0xff] %v2609_v47  ;;  %1964 = vmatprep.subr.mxu1 %v542_v38  ;;  %1935 = vmatpush3.msra.mxu0 %v2529_v1  ;;  %v549_v58 = vand.u32 4294901760, %v548_v14  ;;  %v555_v62 = vsub.f32 %v2584_v21, %v3192_v43  ;;  %v2640_v63 = vand.u32 4294901760, %v2601_v26  ;;  %v2644_v28 = vsub.f32 %v2454_v37, %v2489_v50  ;;  %v2662_v37 = vld [vmem:[%s3180_s1 + $0x10] sm:$0xff] }
  0x21   : > { %1965 = vmatpush3.msra.mxu1 %v430_v53  ;;  %1936 = vmatprep.subr.mxu0 %v2543_v12  ;;  %v437_v38 = vand.u32 4294901760, %v436_v54  ;;  %v443_v14 = vsub.f32 %v2596_v6, %v3195_v7  ;;  %v3198_v43 = vand.u32 4294901760, %v2628_v55  ;;  %v2657_v39 = vand.u32 4294901760, %v2614_v27 }
  0x22   : > { %3272 = vst [vmem:[#allocation15_spill] sm:$0xff] %v2640_v63  ;;  %1966 = vmatprep.subr.mxu1 %v549_v58  ;;  %1937 = vmatpush3.msra.mxu0 %v2557_v19  ;;  %v556_v53 = vand.u32 4294901760, %v555_v62  ;;  %v3201_v54 = vand.u32 4294901760, %v2644_v28  ;;  %v2668_v34 = vsub.f32 %v2481_v46, %v2514_v60  ;;  %v2671_v7 = vand.u32 4294901760, %v2633_v49 }
  0x23   : > { %3273 = vst [vmem:[#allocation16_spill] sm:$0xff] %v2657_v39  ;;  %1967 = vmatpush3.msra.mxu1 %v437_v38  ;;  %1938 = vmatprep.subr.mxu0 %v2570_v20  ;;  %v444_v58 = vand.u32 4294901760, %v443_v14  ;;  %v562_v62 = vsub.f32 %v2628_v55, %v3198_v43  ;;  %v2685_v46 = vsub.f32 %v2494_v51, %v2529_v1  ;;  %v2688_v29 = vand.u32 4294901760, %v2649_v44  ;;  %v2705_v1 = vld [vmem:[%s3180_s1 + $0x8] sm:$0xff] }
  0x24   : > { %3274 = vst [vmem:[#allocation17_spill] sm:$0xff] %v2671_v7  ;;  %1968 = vmatprep.subr.mxu1 %v556_v53  ;;  %1939 = vmatpush3.msra.mxu0 %v2587_v57  ;;  %v450_v38 = vsub.f32 %v2644_v28, %v3201_v54  ;;  %v2697_v43 = vsub.f32 %v2504_v56, %v2543_v12  ;;  %v2700_v51 = vand.u32 4294901760, %v2662_v37  ;;  %v2714_v56 = vand.u32 4294901760, %v2676_v33  ;;  %v2719_v12 = vld [vmem:[%s3180_s1 + $0x80] sm:$0xff] }
  0x25   : > { %3275 = vst [vmem:[#allocation18_spill] sm:$0xff] %v2688_v29  ;;  %1969 = vmatpush3.msra.mxu1 %v444_v58  ;;  %1940 = vmatprep.subr.mxu0 %v2609_v47  ;;  %v563_v53 = vand.u32 4294901760, %v562_v62  ;;  %v2711_v14 = vsub.f32 %v2519_v61, %v2557_v19  ;;  %v3278_v61 = vand.u32 4294901760, %v2668_v34  ;;  %v2735_v19 = vsub.f32 %v2534_v2, %v2570_v20  ;;  %v2752_v2 = vld [vmem:[%s3180_s1] sm:$0xff] }
  0x26   : > { %3276 = vst [vmem:[#allocation19_spill] sm:$0xff] %v2700_v51  ;;  %3277 = vst [vmem:[#allocation20_spill] sm:$0xff] %v2714_v56  ;;  %1941 = vmatpush3.msra.mxu0 %v2640_v63  ;;  %v451_v58 = vand.u32 4294901760, %v450_v38  ;;  %v3220_v54 = vand.u32 4294901760, %v2697_v43  ;;  %v3280_v60 = vand.u32 4294901760, %v2685_v46  ;;  %v2743_v41 = vand.u32 4294901760, %v2705_v1 }
  0x27   : > { %v569_v62 = vsub.f32 %v2668_v34, %v3278_v61  ;;  %3279 = vst [vmem:[#allocation21_spill] sm:$0xff] %v2735_v19  ;;  %1970 = vmatprep.subr.mxu1 %v563_v53  ;;  %1942 = vmatprep.subr.mxu0 %v2657_v39  ;;  %v2747_v61 = vsub.f32 %v2548_v13, %v2587_v57  ;;  %v2760_v20 = vand.u32 4294901760, %v2719_v12  ;;  %v235_v13 = vld [vmem:[%s2726_s14 + $0x8] sm:$0xff]  ;;  %v3282_v36 = vand.u32 4294901760, %v2711_v14 }
  0x28   : > { %v457_v50 = vsub.f32 %v2685_v46, %v3280_v60  ;;  %1971 = vmatpush3.msra.mxu1 %v451_v58  ;;  %1943 = vmatpush3.msra.mxu0 %v2671_v7  ;;  %v576_v60 = vsub.f32 %v2697_v43, %v3220_v54  ;;  %v2770_v32 = vsub.f32 %v2575_v52, %v2609_v47  ;;  %v234_v54 = vld [vmem:[%s2726_s14] sm:$0xff]  ;;  %v3283_v30 = vand.u32 4294901760, %v2735_v19 }
  0x29   : > { %3281 = vst [vmem:[#allocation22_spill] sm:$0xff] %v2747_v61  ;;  %v570_v53 = vand.u32 4294901760, %v569_v62  ;;  %1944 = vmatprep.subr.mxu0 %v2688_v29  ;;  %v464_v58 = vsub.f32 %v2711_v14, %v3282_v36  ;;  %v2778_v24 = vand.u32 4294901760, %v2752_v2  ;;  %v2782_v36 = vsub.f32 %v2601_v26, %v2640_v63 }
  0x2a   : > { %v458_v57 = vand.u32 4294901760, %v457_v50  ;;  %v577_v38 = vand.u32 4294901760, %v576_v60  ;;  %1945 = vmatpush3.msra.mxu0 %v2700_v51  ;;  %v583_v50 = vsub.f32 %v2735_v19, %v3283_v30  ;;  %v3285_v52 = vand.u32 4294901760, %v2747_v61 }
  0x2b   : > { %1972 = vmatprep.subr.mxu1 %v570_v53  ;;  %3284 = vst [vmem:[#allocation23_spill] sm:$0xff] %v2782_v36  ;;  %v465_v62 = vand.u32 4294901760, %v464_v58  ;;  %1946 = vmatprep.subr.mxu0 %v2714_v56  ;;  %v3229_v60 = vand.u32 4294901760, %v2770_v32  ;;  %v2789_v47 = vand.u32 4294901760, %v235_v13  ;;  %v3230_v19 = vand.u32 4294901760, %v2782_v36 }
  0x2c   : > { %1973 = vmatpush3.msra.mxu1 %v458_v57  ;;  %v471_v53 = vsub.f32 %v2747_v61, %v3285_v52  ;;  %v584_v30 = vand.u32 4294901760, %v583_v50  ;;  %1947 = vmatpush3.msra.mxu0 %v2743_v41  ;;  %v2795_v57 = vsub.f32 %v2614_v27, %v2657_v39  ;;  %v2797_v26 = vand.u32 4294901760, %v234_v54 }
  0x2d   : > { %3286 = vst [vmem:[#allocation24_spill] sm:$0xff] %v2789_v47  ;;  %1974 = vmatprep.subr.mxu1 %v577_v38  ;;  %1948 = vmatprep.subr.mxu0 %v2760_v20  ;;  %v590_v52 = vsub.f32 %v2770_v32, %v3229_v60  ;;  %v2804_v38 = vsub.f32 %v235_v13, %v2789_v47 }
  0x2e   : > { %3287 = vst [vmem:[#allocation25_spill] sm:$0xff] %v2797_v26  ;;  %1975 = vmatpush3.msra.mxu1 %v465_v62  ;;  %v472_v58 = vand.u32 4294901760, %v471_v53  ;;  %v2808_v50 = vsub.f32 %v2633_v49, %v2671_v7  ;;  %1949 = vmatpush3.msra.mxu0 %v2778_v24  ;;  %v478_v27 = vsub.f32 %v2782_v36, %v3230_v19 }
  0x2f   : > { %1976 = vmatprep.subr.mxu1 %v584_v30  ;;  %v2816_v53 = vsub.f32 %v234_v54, %v2797_v26  ;;  %v2820_v13 = vsub.f32 %v2649_v44, %v2688_v29  ;;  %v591_v60 = vand.u32 4294901760, %v590_v52  ;;  %v3235_v49 = vand.u32 4294901760, %v2804_v38  ;;  %1994 = vmatprep.subr.mxu0 %v2386_v18 }
  0x30   : > { %3288 = vst [vmem:[#allocation26_spill] sm:$0xff] %v2808_v50  ;;  %1977 = vmatpush3.msra.mxu1 %v472_v58  ;;  %v3238_v30 = vand.u32 4294901760, %v2808_v50  ;;  %v2827_v19 = vsub.f32 %v2662_v37, %v2700_v51  ;;  %v479_v62 = vand.u32 4294901760, %v478_v27  ;;  %v3289_v54 = vand.u32 4294901760, %v2795_v57  ;;  %622 = vmatprep.mubr.f32.mxu1 %v2789_v47 }
  0x31   : > { %1978 = vmatprep.subr.mxu1 %v591_v60  ;;  %v369_v52 = vsub.f32 %v2804_v38, %v3235_v49  ;;  %v3290_v58 = vand.u32 4294901760, %v2816_v53  ;;  %v3291_v47 = vand.u32 4294901760, %v2820_v13  ;;  %v2854_v51 = vsub.f32 %v2705_v1, %v2743_v41 }
  0x32   : > { %v597_v7 = vsub.f32 %v2795_v57, %v3289_v54  ;;  %v485_v37 = vsub.f32 %v2808_v50, %v3238_v30  ;;  %v2844_v54 = vsub.f32 %v2676_v33, %v2714_v56  ;;  %1979 = vmatpush3.msra.mxu1 %v479_v62  ;;  %v3292_v29 = vand.u32 4294901760, %v2827_v19 }
  0x33   : > { %v375_v60 = vsub.f32 %v2816_v53, %v3290_v58  ;;  %v604_v49 = vsub.f32 %v2820_v13, %v3291_v47  ;;  %v370_v30 = vand.u32 4294901760, %v369_v52  ;;  %v3245_v58 = vand.u32 4294901760, %v2854_v51 }
  0x34   : > { %v598_v44 = vand.u32 4294901760, %v597_v7  ;;  %v486_v27 = vand.u32 4294901760, %v485_v37  ;;  %v492_v33 = vsub.f32 %v2827_v19, %v3292_v29  ;;  %v3246_v7 = vand.u32 4294901760, %v2844_v54 }
  0x35   : > { %v376_v62 = vand.u32 4294901760, %v375_v60  ;;  %v605_v56 = vand.u32 4294901760, %v604_v49  ;;  %v2863_v47 = vsub.f32 %v2719_v12, %v2760_v20  ;;  %371 = vmatprep.mubr.f32.mxu0 %v370_v30  ;;  %v2870_v29 = vsub.f32 %v2752_v2, %v2778_v24  ;;  %v237_v60 = vld [vmem:[%s2726_s14 + $0x18] sm:$0xff] }
  0x36   : > { %1980 = vmatprep.subr.mxu1 %v598_v44  ;;  %v493_v1 = vand.u32 4294901760, %v492_v33  ;;  %v611_v52 = vsub.f32 %v2844_v54, %v3246_v7  ;;  %v499_v49 = vsub.f32 %v2854_v51, %v3245_v58  ;;  %v3300_v58 = vld [vmem:[#allocation6_spill] sm:$0xff] }
  0x37   : > { %1981 = vmatpush3.msra.mxu1 %v486_v27  ;;  %3293 = vst [vmem:[#allocation27_spill] sm:$0xff] %v2870_v29  ;;  %377 = vmatmul.mubr.f32.vlgmr.msra.gmra.mxu0 %v376_v62  ;;  %v3244_v12 = vand.u32 4294901760, %v2863_v47  ;;  %v3243_v44 = vand.u32 4294901760, %v2870_v29  ;;  %v236_v62 = vld [vmem:[%s2726_s14 + $0x10] sm:$0xff]  ;;  %s233_s14 = scalar_lea.vmem %s3183_s4, %s1916_s7 }
  0x38   : > { %1982 = vmatprep.subr.mxu1 %v605_v56  ;;  %1995 = vmatpush3.msra.mxu0 %v2408_v23  ;;  %v612_v30 = vand.u32 4294901760, %v611_v52  ;;  %v500_v2 = vand.u32 4294901760, %v499_v49  ;;  %v2898_v52 = vand.u32 4294901760, %v236_v62 }
  0x39   : > { %1983 = vmatpush3.msra.mxu1 %v493_v1  ;;  %1996 = vmatprep.subr.mxu0 %v2414_v25  ;;  %v618_v56 = vsub.f32 %v2863_v47, %v3244_v12  ;;  %v506_v37 = vsub.f32 %v2870_v29, %v3243_v44  ;;  %v2892_v1 = vand.u32 4294901760, %v237_v60  ;;  %v3299_v12 = vld [vmem:[#allocation5_spill] sm:$0xff] }
  0x3a   : > { %1997 = vmatpush3.msra.mxu0 %v2437_v31  ;;  %1984 = vmatprep.subr.mxu1 %v612_v30  ;;  %v2912_v30 = vsub.f32 %v236_v62, %v2898_v52  ;;  %v3298_v62 = vld [vmem:[#allocation4_spill] sm:$0xff] }
  0x3b   : > { %1998 = vmatprep.subr.mxu0 %v2446_v35  ;;  %1985 = vmatpush3.msra.mxu1 %v500_v2  ;;  %v619_v27 = vand.u32 4294901760, %v618_v56  ;;  %v507_v33 = vand.u32 4294901760, %v506_v37  ;;  %3294 = vst [vmem:[#allocation28_spill] sm:$0xff] %v2892_v1  ;;  %v2905_v49 = vsub.f32 %v237_v60, %v2892_v1  ;;  %v3295_v37 = vld [vmem:[#allocation2_spill] sm:$0xff]  ;;  %v3296_v60 = vld [vmem:[#allocation3_spill] sm:$0xff] }
  0x3c   : > { %1999 = vmatpush3.msra.mxu0 %v2462_v40  ;;  %v3251_v56 = vand.u32 4294901760, %v2912_v30 }
  0x3d   : > { %1986 = vmatprep.subr.mxu1 %v619_v27  ;;  %2000 = vmatprep.subr.mxu0 %v2476_v45  ;;  %v3247_v2 = vand.u32 4294901760, %v2905_v49 }
  0x3e   : > { %1987 = vmatpush3.msra.mxu1 %v507_v33  ;;  %2001 = vmatpush3.msra.mxu0 %v2511_v59  ;;  %v3297_v33 = vld [vmem:[#allocation21_spill] sm:$0xff]  ;;  %v390_v44 = vsub.f32 %v2912_v30, %v3251_v56  ;;  %v3304_v56 = vld [vmem:[#allocation10_spill] sm:$0xff] }
  0x3f   : > { %624 = vmatmul.mubr.f32.vlgmr.msra.gmra.mxu1 %v2797_v26  ;;  %2002 = vmatprep.subr.mxu0 %v2526_v0  ;;  %v384_v27 = vsub.f32 %v2905_v49, %v3247_v2  ;;  %v3301_v2 = vld [vmem:[#allocation7_spill] sm:$0xff]  ;;  %v3302_v26 = vld [vmem:[#allocation8_spill] sm:$0xff] }
  0x40   : > { %2032 = vmatprep.subr.mxu1 %v2348_v3  ;;  %2003 = vmatpush3.msra.mxu0 %v2540_v8 }
  0x41   : > { %2033 = vmatpush3.msra.mxu1 %v2350_v4  ;;  %2004 = vmatprep.subr.mxu0 %v2554_v42  ;;  %v385_v7 = vand.u32 4294901760, %v384_v27  ;;  %v3306_v27 = vld [vmem:[#allocation12_spill] sm:$0xff] }
  0x42   : > { %2034 = vmatprep.subr.mxu1 %v2352_v5  ;;  %2005 = vmatpush3.msra.mxu0 %v2567_v48 }
  0x43   : > { %2035 = vmatpush3.msra.mxu1 %v2363_v9  ;;  %2006 = vmatprep.subr.mxu0 %v2584_v21 }
  0x44   : > { %2036 = vmatprep.subr.mxu1 %v2365_v10  ;;  %2007 = vmatpush3.msra.mxu0 %v2596_v6 }
  0x45   : > { %2037 = vmatpush3.msra.mxu1 %v2367_v11  ;;  %2008 = vmatprep.subr.mxu0 %v2628_v55 }
  0x46   : > { %2038 = vmatprep.subr.mxu1 %v2379_v15  ;;  %2009 = vmatpush3.msra.mxu0 %v2644_v28 }
  0x47   : > { %2039 = vmatpush3.msra.mxu1 %v2381_v16  ;;  %2010 = vmatprep.subr.mxu0 %v2668_v34 }
  0x48   : > { %2040 = vmatprep.subr.mxu1 %v2383_v17  ;;  %2011 = vmatpush3.msra.mxu0 %v2685_v46 }
  0x49   : > { %2041 = vmatpush3.msra.mxu1 %v2405_v22  ;;  %2012 = vmatprep.subr.mxu0 %v2697_v43 }
  0x4a   : > { %2042 = vmatprep.subr.mxu1 %v3295_v37  ;;  %2013 = vmatpush3.msra.mxu0 %v2711_v14 }
  0x4b   : > { %2043 = vmatpush3.msra.mxu1 %v3296_v60  ;;  %2014 = vmatprep.subr.mxu0 %v3297_v33 }
  0x4c   : > { %2044 = vmatprep.subr.mxu1 %v3298_v62  ;;  %2015 = vmatpush3.msra.mxu0 %v2747_v61  ;;  %v391_v61 = vand.u32 4294901760, %v390_v44  ;;  %v3303_v62 = vld [vmem:[#allocation9_spill] sm:$0xff]  ;;  %v3308_v44 = vld [vmem:[#allocation14_spill] sm:$0xff] }
  0x4d   : > { %2045 = vmatpush3.msra.mxu1 %v3299_v12  ;;  %2016 = vmatprep.subr.mxu0 %v2770_v32 }
  0x4e   : > { %2046 = vmatprep.subr.mxu1 %v3300_v58  ;;  %2017 = vmatpush3.msra.mxu0 %v2782_v36  ;;  %v3305_v36 = vld [vmem:[#allocation11_spill] sm:$0xff] }
  0x4f   : > { %2047 = vmatpush3.msra.mxu1 %v3301_v2  ;;  %2018 = vmatprep.subr.mxu0 %v2795_v57 }
  0x50   : > { %2048 = vmatprep.subr.mxu1 %v3302_v26  ;;  %2019 = vmatpush3.msra.mxu0 %v2808_v50  ;;  %v3307_v50 = vld [vmem:[#allocation13_spill] sm:$0xff] }
  0x51   : > { %2049 = vmatpush3.msra.mxu1 %v3303_v62  ;;  %2020 = vmatprep.subr.mxu0 %v2820_v13 }
  0x52   : > { %2050 = vmatprep.subr.mxu1 %v3304_v56  ;;  %386 = vmatprep.mubr.f32.mxu0 %v385_v7  ;;  %v3310_v7 = vand.u32 4294901760, %v2408_v23  ;;  %v3317_v23 = vand.u32 4294901760, %v2446_v35  ;;  %v3322_v35 = vand.u32 4294901760, %v2816_v53 }
  0x53   : > { %2021 = vmatpush3.msra.mxu0 %v2827_v19  ;;  %2051 = vmatpush3.msra.mxu1 %v3305_v36 }
  0x54   : > { %392 = vmatmul.mubr.f32.gmra.mxu0 %v391_v61  ;;  %2022 = vmatprep.subr.mxu0 %v2844_v54  ;;  %v3309_v61 = vand.u32 4294901760, %v2386_v18  ;;  %v3316_v18 = vld [vmem:[#allocation20_spill] sm:$0xff] }
  0x55   : > { %2052 = vmatprep.subr.mxu1 %v3306_v27  ;;  %2023 = vmatpush3.msra.mxu0 %v2854_v51 }
  0x56   : > { %2053 = vmatpush3.msra.mxu1 %v3307_v50  ;;  %2024 = vmatprep.subr.mxu0 %v2863_v47 }
  0x57   : > { %2054 = vmatprep.subr.mxu1 %v3308_v44  ;;  %2025 = vmatpush3.msra.mxu0 %v2870_v29  ;;  %v3311_v44 = vld [vmem:[#allocation17_spill] sm:$0xff]  ;;  %v3312_v29 = vand.u32 4294901760, %v2414_v25  ;;  %v3318_v25 = vand.u32 4294901760, %v2462_v40  ;;  %v3324_v40 = vand.u32 4294901760, %v2540_v8  ;;  %v3333_v8 = vand.u32 4294901760, %v2668_v34  ;;  %v3338_v34 = vld [vmem:[#allocation4_spill] sm:$0xff] }
  0x58   : > { %766 = vmatprep.mubr.f32.mxu0 %v2804_v38  ;;  %2055 = vmatpush3.msra.mxu1 %v2640_v63  ;;  %v3313_v63 = vld [vmem:[#allocation18_spill] sm:$0xff] }
  0x59   : > { %629 = vmatprep.mubr.f32.mxu1 %v2892_v1  ;;  %769 = vmatmul.mubr.f32.vlgmr.msra.gmra.mxu0 %v2816_v53  ;;  %v3314_v1 = vld [vmem:[#allocation19_spill] sm:$0xff] }
  0x5a   : > { %2056 = vmatprep.subr.mxu1 %v2657_v39  ;;  %2070 = vmatprep.subr.mxu0 %v3309_v61  ;;  %v3315_v39 = vand.u32 4294901760, %v2437_v31  ;;  %v3320_v31 = vand.u32 4294901760, %v2804_v38  ;;  %v3323_v61 = vand.u32 4294901760, %v2526_v0  ;;  %v3327_v38 = vand.u32 4294901760, %v2567_v48  ;;  %v3353_v53 = vld [vmem:[#allocation27_spill] sm:$0xff] }
  0x5b   : > { %631 = vmatmul.mubr.f32.gmra.mxu1 %v2898_v52  ;;  %2071 = vmatpush3.msra.mxu0 %v3310_v7  ;;  %v3329_v0 = vand.u32 4294901760, %v2584_v21  ;;  %v3344_v21 = vand.u32 4294901760, %v2795_v57  ;;  %v3351_v57 = vand.u32 4294901760, %v2863_v47 }
  0x5c   : > { %2057 = vmatpush3.msra.mxu1 %v3311_v44  ;;  %2072 = vmatprep.subr.mxu0 %v3312_v29  ;;  %v3319_v29 = vand.u32 4294901760, %v2476_v45  ;;  %v3325_v45 = vand.u32 4294901760, %v2554_v42  ;;  %v3342_v42 = vld [vmem:[#allocation23_spill] sm:$0xff] }
  0x5d   : > { %2058 = vmatprep.subr.mxu1 %v3313_v63  ;;  %775 = vmatprep.mubr.f32.mxu0 %v2905_v49  ;;  %v3343_v48 = vand.u32 4294901760, %v3342_v42 }
  0x5e   : > { %2059 = vmatpush3.msra.mxu1 %v3314_v1  ;;  %2073 = vmatpush3.msra.mxu0 %v3315_v39  ;;  %v3321_v39 = vand.u32 4294901760, %v2511_v59  ;;  %v3326_v59 = vand.u32 4294901760, %v2905_v49  ;;  %v2293_v49 = vmov 0  }
  0x5f   : > { %778 = vmatmul.mubr.f32.gmra.mxu0 %v2912_v30  ;;  %2060 = vmatprep.subr.mxu1 %v3316_v18 }
  0x60   : > { %2074 = vmatprep.subr.mxu0 %v3317_v23  ;;  %2061 = vmatpush3.msra.mxu1 %v2743_v41 }
  0x61   : > { %2075 = vmatpush3.msra.mxu0 %v3318_v25  ;;  %2062 = vmatprep.subr.mxu1 %v2760_v20 }
  0x62   : > { %2076 = vmatprep.subr.mxu0 %v3319_v29  ;;  %2063 = vmatpush3.msra.mxu1 %v2778_v24 }
  0x63   : > { %882 = vmatprep.mubr.f32.mxu1 %v3320_v31  ;;  %2077 = vmatpush3.msra.mxu0 %v3321_v39 }
  0x64   : > { %886 = vmatmul.mubr.f32.vlgmr.msra.gmra.mxu1 %v3322_v35  ;;  %2078 = vmatprep.subr.mxu0 %v3323_v61  ;;  %v1189_v35 = vld [vmem:[%s3181_s2 + $0x8] sm:$0xff]  ;;  %v1190_v61 = vld [vmem:[%s3181_s2 + $0x10] sm:$0xff] }
  0x65   : > { %2108 = vmatprep.subr.mxu1 %v2348_v3  ;;  %2079 = vmatpush3.msra.mxu0 %v3324_v40  ;;  %v3328_v3 = vand.u32 4294901760, %v2912_v30  ;;  %v1193_v30 = vld [vmem:[%s3182_s3 + $0x8] sm:$0xff] }
  0x66   : > { %2109 = vmatpush3.msra.mxu1 %v2350_v4  ;;  %2080 = vmatprep.subr.mxu0 %v3325_v45  ;;  %v3330_v4 = vand.u32 4294901760, %v2596_v6  ;;  %v3345_v6 = vld [vmem:[#allocation26_spill] sm:$0xff] }
  0x67   : > { %2110 = vmatprep.subr.mxu1 %v2352_v5  ;;  %893 = vmatprep.mubr.f32.mxu1 %v3326_v59  ;;  %v3331_v5 = vand.u32 4294901760, %v2628_v55 }
  0x68   : > { %2081 = vmatpush3.msra.mxu0 %v3327_v38  ;;  %2111 = vmatpush3.msra.mxu1 %v2363_v9  ;;  %v3332_v9 = vand.u32 4294901760, %v2644_v28  ;;  %v3348_v28 = vand.u32 4294901760, %v2827_v19  ;;  %v3354_v19 = vand.u32 4294901760, %v3353_v53 }
  0x69   : > { %897 = vmatmul.mubr.f32.gmra.mxu1 %v3328_v3  ;;  %2082 = vmatprep.subr.mxu0 %v3329_v0  ;;  %v1221_v3 = vsel %vm1216_vm0, %v1189_v35, 0  ;;  %v1224_v0 = vsel %vm1216_vm0, %v1190_v61, 0 }
  0x6a   : > { %2112 = vmatprep.subr.mxu1 %v2365_v10  ;;  %2083 = vmatpush3.msra.mxu0 %v3330_v4  ;;  %v3334_v10 = vand.u32 4294901760, %v2685_v46  ;;  %v3349_v46 = vand.u32 4294901760, %v2844_v54  ;;  %v3357_v54 = vld [vmem:[#allocation25_spill] sm:$0xff] }
  0x6b   : > { %2113 = vmatpush3.msra.mxu1 %v2367_v11  ;;  %2084 = vmatprep.subr.mxu0 %v3331_v5  ;;  %v3335_v11 = vand.u32 4294901760, %v2697_v43  ;;  %v3346_v43 = vand.u32 4294901760, %v3345_v6 }
  0x6c   : > { %2114 = vmatprep.subr.mxu1 %v2379_v15  ;;  %2085 = vmatpush3.msra.mxu0 %v3332_v9  ;;  %v3336_v15 = vand.u32 4294901760, %v2711_v14  ;;  %v3350_v14 = vand.u32 4294901760, %v2854_v51  ;;  %v3359_v51 = vld [vmem:[#allocation28_spill] sm:$0xff] }
  0x6d   : > { %2115 = vmatpush3.msra.mxu1 %v2381_v16  ;;  %2086 = vmatprep.subr.mxu0 %v3333_v8  ;;  %v3337_v16 = vand.u32 4294901760, %v3297_v33 }
  0x6e   : > { %2116 = vmatprep.subr.mxu1 %v2383_v17  ;;  %2087 = vmatpush3.msra.mxu0 %v3334_v10  ;;  %v3339_v17 = vld [vmem:[#allocation22_spill] sm:$0xff]  ;;  %v1191_v10 = vld [vmem:[%s3181_s2 + $0x18] sm:$0xff] }
  0x6f   : > { %2117 = vmatpush3.msra.mxu1 %v2405_v22  ;;  %2088 = vmatprep.subr.mxu0 %v3335_v11  ;;  %v3340_v55 = vand.u32 4294901760, %v3339_v17  ;;  %v3341_v22 = vand.u32 4294901760, %v2770_v32  ;;  %v3347_v32 = vand.u32 4294901760, %v2820_v13  ;;  %v3355_v13 = vld [vmem:[#allocation24_spill] sm:$0xff] }
  0x70   : > { %2118 = vmatprep.subr.mxu1 %v3295_v37  ;;  %2089 = vmatpush3.msra.mxu0 %v3336_v15 }
  0x71   : > { %2119 = vmatpush3.msra.mxu1 %v3296_v60  ;;  %2090 = vmatprep.subr.mxu0 %v3337_v16 }
  0x72   : > { %2120 = vmatprep.subr.mxu1 %v3338_v34  ;;  %2091 = vmatpush3.msra.mxu0 %v3340_v55  ;;  %v3122_v34 = vand.u32 4294901760, %v1221_v3  ;;  %v3124_v55 = vand.u32 4294901760, %v1224_v0 }
  0x73   : > { %2121 = vmatpush3.msra.mxu1 %v3299_v12  ;;  %2092 = vmatprep.subr.mxu0 %v3341_v22  ;;  %v1227_v22 = vsel %vm1216_vm0, %v1191_v10, 0 }
  0x74   : > { %2122 = vmatprep.subr.mxu1 %v3300_v58  ;;  %2093 = vmatpush3.msra.mxu0 %v3343_v48  ;;  %v3358_v58 = vld [vmem:[#allocation16_spill] sm:$0xff]  ;;  %v3133_v53 = vsub.f32 %v1224_v0, %v3124_v55 }
  0x75   : > { %2123 = vmatpush3.msra.mxu1 %v3301_v2  ;;  %2094 = vmatprep.subr.mxu0 %v3344_v21  ;;  %v1195_v2 = vld [vmem:[%s3182_s3 + $0x18] sm:$0xff] }
  0x76   : > { %2124 = vmatprep.subr.mxu1 %v3302_v26  ;;  %2095 = vmatpush3.msra.mxu0 %v3346_v43  ;;  %v3352_v26 = vld [vmem:[#allocation14_spill] sm:$0xff] }
  0x77   : > { %2125 = vmatpush3.msra.mxu1 %v3303_v62  ;;  %2096 = vmatprep.subr.mxu0 %v3347_v32 }
  0x78   : > { %2126 = vmatprep.subr.mxu1 %v3304_v56  ;;  %2097 = vmatpush3.msra.mxu0 %v3348_v28 }
  0x79   : > { %2127 = vmatpush3.msra.mxu1 %v3305_v36  ;;  %2098 = vmatprep.subr.mxu0 %v3349_v46  ;;  %v3356_v36 = vld [vmem:[#allocation15_spill] sm:$0xff] }
  0x7a   : > { %2128 = vmatprep.subr.mxu1 %v3306_v27  ;;  %2099 = vmatpush3.msra.mxu0 %v3350_v14  ;;  %v3128_v14 = vsub.f32 %v1221_v3, %v3122_v34 }
  0x7b   : > { %2129 = vmatpush3.msra.mxu1 %v3307_v50  ;;  %2100 = vmatprep.subr.mxu0 %v3351_v57  ;;  %v3130_v57 = vand.u32 4294901760, %v1227_v22 }
  0x7c   : > { %2130 = vmatprep.subr.mxu1 %v3352_v26  ;;  %2101 = vmatpush3.msra.mxu0 %v3354_v19 }
  0x7d   : > { %1063 = vmatprep.mubr.f32.mxu0 %v3355_v13  ;;  %2131 = vmatpush3.msra.mxu1 %v3356_v36 }
  0x7e   : > { %1065 = vmatmul.mubr.f32.vlgmr.msra.gmra.mxu0 %v3357_v54  ;;  %2132 = vmatprep.subr.mxu1 %v3358_v58 }
  0x7f   : > { %2133 = vmatpush3.msra.mxu1 %v3311_v44  ;;  %1070 = vmatprep.mubr.f32.mxu0 %v3359_v51 }
  0x80   : > { %2134 = vmatprep.subr.mxu1 %v3313_v63  ;;  %1174 = vmatprep.mubr.f32.mxu1 %v3355_v13  ;;  %v1188_v63 = vld [vmem:[%s3181_s2] sm:$0xff] }
  0x81   : > { %2135 = vmatpush3.msra.mxu1 %v3314_v1  ;;  %v1218_v50 = vsel %vm1216_vm0, %v1188_v63, 0  ;;  %v1192_v1 = vld [vmem:[%s3182_s3] sm:$0xff]  ;;  %2267 = vset.pattern.permute.xlu0 %v2293_v49 }
  0x82   : > { %1072 = vmatmul.mubr.f32.gmra.mxu0 %v2898_v52  ;;  %2136 = vmatprep.subr.mxu1 %v3316_v18  ;;  %v3089_v47 = vand.u32 4294901760, %v1218_v50 }
  0x83   : > { %2137 = vmatpush3.msra.mxu1 %v2743_v41  ;;  %2268 = vset.pattern.permute.xlu1 %v2293_v49 }
  0x84   : > { %2138 = vmatprep.subr.mxu1 %v2760_v20  ;;  %v3092_v41 = vsub.f32 %v1218_v50, %v3089_v47  ;;  %1198 = vperm.xlu0 %2267, %v1192_v1   ;;  %v1308_v50 = vand.u32 4294901760, %v3128_v14  ;;  %v1318_v1 = vand.u32 4294901760, %v3133_v53 }
  0x85   : > { %2139 = vmatpush3.msra.mxu1 %v2778_v24 }
  0x86   : > { %1176 = vmatmul.mubr.f32.vlgmr.msra.gmra.mxu1 %v3357_v54  ;;  %v1298_v24 = vand.u32 4294901760, %v3092_v41 }
  0x87   : > { %1181 = vmatprep.mubr.f32.mxu1 %v3359_v51 }
  0x88   : > { %v1299_v20 = vsub.f32 %v3092_v41, %v1298_v24  ;;  %1203 = vperm.xlu0 %2267, %v1193_v30  }
  0x8a   : > { %1183 = vmatmul.mubr.f32.gmra.mxu1 %v2898_v52  ;;  %v1300_v12 = vand.u32 4294901760, %v1299_v20  ;;  %v1194_v52 = vld [vmem:[%s3182_s3 + $0x10] sm:$0xff]  ;;  %v3137_v20 = vsub.f32 %v1227_v22, %v3130_v57 }
  0x8b   : > { %2196 = vmatprep.mubr.f32.mxu1 %v3089_v47  ;;  %1208 = vperm.xlu1 %2268, %v1194_v52  }
  0x8c   : > { %2186 = vmatprep.mubr.f32.mxu0 %v1300_v12 }
  0x8f   : > { %1213 = vperm.xlu1 %2268, %v1195_v2  }
  0xf7   : > { %v1950_v56 = vpop.f32.mrf.mxu0 }
  0xf9   : > { %v1951_v37 = vpop.f32.mrf.mxu0 }
  0xfa   : > { %v1952_v4 = vadd.f32 %v1951_v37, %v1950_v56  ;;  %v1309_v37 = vsub.f32 %v3128_v14, %v1308_v50 }
  0xff   : > { %v1988_v33 = vpop.f32.mrf.mxu1 }
 0x101   : > { %v1989_v27 = vpop.f32.mrf.mxu1 }
 0x102   : > { %v1990_v45 = vadd.f32 %v1989_v27, %v1988_v33  ;;  %v1319_v33 = vsub.f32 %v3133_v53, %v1318_v1 }
 0x104   : > { %v626_v15 = vadd.f32 %v1990_v45, %v1952_v4 }
 0x114   : > { %v1953_v60 = vpop.f32.mrf.mxu0 }
 0x116   : > { %v1954_v62 = vpop.f32.mrf.mxu0 }
 0x117   : > { %v1955_v5 = vadd.f32 %v1954_v62, %v1953_v60  ;;  %v1328_v60 = vand.u32 4294901760, %v3137_v20 }
 0x119   : > { %v2026_v44 = vpop.f32.mrf.mxu0 }
 0x11b   : > { %v1991_v7 = vpop.f32.mrf.mxu1  ;;  %v2027_v18 = vpop.f32.mrf.mxu0 }
 0x11c   : > { %v2028_v9 = vadd.f32 %v2027_v18, %v2026_v44  ;;  %v1310_v44 = vand.u32 4294901760, %v1309_v37 }
 0x11d   : > { %v1992_v23 = vpop.f32.mrf.mxu1 }
 0x11e   : > { %v1993_v8 = vadd.f32 %v1992_v23, %v1991_v7  ;;  %v771_v42 = vadd.f32 %v2028_v9, %v626_v15  ;;  %v1329_v7 = vsub.f32 %v3137_v20, %v1328_v60  ;;  %v1320_v23 = vand.u32 4294901760, %v1319_v33 }
 0x11f   : > { %v2029_v25 = vpop.f32.mrf.mxu0 }
 0x120   : > { %v633_v48 = vadd.f32 %v1993_v8, %v1955_v5 }
 0x121   : > { %v2030_v31 = vpop.f32.mrf.mxu0 }
 0x122   : > { %v2031_v21 = vadd.f32 %v2030_v31, %v2029_v25 }
 0x124   : > { %v2064_v29 = vpop.f32.mrf.mxu1  ;;  %v780_v19 = vadd.f32 %v2031_v21, %v633_v48 }
 0x126   : > { %v2065_v39 = vpop.f32.mrf.mxu1 }
 0x127   : > { %v2066_v16 = vadd.f32 %v2065_v39, %v2064_v29  ;;  %v1330_v29 = vand.u32 4294901760, %v1329_v7 }
 0x129   : > { %v2067_v59 = vpop.f32.mrf.mxu1  ;;  %v888_v28 = vadd.f32 %v2066_v16, %v771_v42 }
 0x12b   : > { %v2068_v17 = vpop.f32.mrf.mxu1 }
 0x12c   : > { %v2069_v46 = vadd.f32 %v2068_v17, %v2067_v59  ;;  %v1209_v59 = vpop.permute.xlu1 %1208 }
 0x12e   : > { %v899_v51 = vadd.f32 %v2069_v46, %v780_v19 }
 0x130   : > { %v1214_v8 = vpop.permute.xlu1 %1213 }
 0x13e   : > { %v2102_v40 = vpop.f32.mrf.mxu0 }
 0x140   : > { %v2103_v38 = vpop.f32.mrf.mxu0 }
 0x141   : > { %v2104_v6 = vadd.f32 %v2103_v38, %v2102_v40 }
 0x142   : > { %v2105_v11 = vpop.f32.mrf.mxu0 }
 0x143   : > { %v1067_v13 = vadd.f32 %v2104_v6, %v888_v28 }
 0x144   : > { %v2106_v43 = vpop.f32.mrf.mxu0 }
 0x145   : > { %v2107_v36 = vadd.f32 %v2106_v43, %v2105_v11 }
 0x146   : > { %v2140_v32 = vpop.f32.mrf.mxu1 }
 0x147   : > { %v1074_v52 = vadd.f32 %v2107_v36, %v899_v51 }
 0x148   : > { %v2141_v26 = vpop.f32.mrf.mxu1 }
 0x149   : > { %v2142_v54 = vadd.f32 %v2141_v26, %v2140_v32 }
 0x14a   : > { %v2143_v58 = vpop.f32.mrf.mxu1 }
 0x14b   : > { %v1178_v63 = vadd.f32 %v2142_v54, %v1067_v13 }
 0x14c   : > { %v2144_v12 = vpop.f32.mrf.mxu1 }
 0x14d   : > { %v1261_v49 = vand.u32 4294901760, %v1178_v63  ;;  %v2145_v30 = vadd.f32 %v2144_v12, %v2143_v58 }
 0x14f   : > { %v1373_v2 = vsub.f32 %v1178_v63, %v1261_v49  ;;  %v1185_v56 = vadd.f32 %v2145_v30, %v1074_v52 }
 0x151   : > { %v1258_v62 = vand.u32 4294901760, %v1185_v56  ;;  %v1374_v18 = vand.u32 4294901760, %v1373_v2 }
 0x153   : > { %v1366_v27 = vsub.f32 %v1185_v56, %v1258_v62  ;;  %2182 = vmatprep.subr.mxu0 %v1258_v62  ;;  %v1375_v39 = vsub.f32 %v1373_v2, %v1374_v18 }
 0x154   : > { %2183 = vmatpush3.msra.mxu0 %v1258_v62 }
 0x155   : > { %2184 = vmatprep.subr.mxu0 %v1261_v49  ;;  %v1367_v25 = vand.u32 4294901760, %v1366_v27  ;;  %v1376_v61 = vand.u32 4294901760, %v1375_v39 }
 0x156   : > { %2185 = vmatpush3.msra.mxu0 %v1261_v49 }
 0x157   : > { %2187 = vmatmul.mubr.f32.vlgmr.msra.gmra.mxu0 %v1310_v44  ;;  %2202 = vmatprep.subr.mxu0 %v1366_v27  ;;  %v1368_v31 = vsub.f32 %v1366_v27, %v1367_v25 }
 0x158   : > { %2203 = vmatpush3.msra.mxu0 %v1366_v27  ;;  %2189 = vmatprep.mubr.f32.mxu0 %v1320_v23 }
 0x159   : > { %2204 = vmatprep.subr.mxu0 %v1373_v2  ;;  %v1369_v35 = vand.u32 4294901760, %v1368_v31 }
 0x15a   : > { %2205 = vmatpush3.msra.mxu0 %v1373_v2 }
 0x15b   : > { %2190 = vmatmul.mubr.f32.gmra.mxu0 %v1330_v29  ;;  %2192 = vmatprep.subr.mxu1 %v1369_v35 }
 0x15c   : > { %2222 = vmatprep.subr.mxu0 %v1367_v25  ;;  %2193 = vmatpush3.msra.mxu1 %v1369_v35 }
 0x15d   : > { %2194 = vmatprep.subr.mxu1 %v1376_v61  ;;  %2206 = vmatprep.mubr.f32.mxu0 %v3092_v41 }
 0x15e   : > { %2195 = vmatpush3.msra.mxu1 %v1376_v61 }
 0x15f   : > { %2197 = vmatmul.mubr.f32.vlgmr.msra.gmra.mxu1 %v3122_v34  ;;  %2207 = vmatmul.mubr.f32.vlgmr.msra.gmra.mxu0 %v3128_v14 }
 0x160   : > { %2212 = vmatprep.subr.mxu1 %v1258_v62  ;;  %2223 = vmatpush3.msra.mxu0 %v1367_v25 }
 0x161   : > { %2213 = vmatpush3.msra.mxu1 %v1258_v62  ;;  %2224 = vmatprep.subr.mxu0 %v1374_v18 }
 0x162   : > { %2214 = vmatprep.subr.mxu1 %v1261_v49  ;;  %2225 = vmatpush3.msra.mxu0 %v1374_v18 }
 0x163   : > { %2199 = vmatprep.mubr.f32.mxu1 %v3124_v55  ;;  %2215 = vmatpush3.msra.mxu1 %v1261_v49 }
 0x164   : > { %2200 = vmatmul.mubr.f32.gmra.mxu1 %v3130_v57  ;;  %2232 = vmatprep.subr.mxu1 %v1258_v62 }
 0x165   : > { %2209 = vmatprep.mubr.f32.mxu0 %v3133_v53  ;;  %2216 = vmatprep.mubr.f32.mxu1 %v1298_v24  ;;  %v1199_v24 = vpop.permute.xlu0 %1198 }
 0x166   : > { %2210 = vmatmul.mubr.f32.gmra.mxu0 %v3137_v20 }
 0x167   : > { %2226 = vmatprep.mubr.f32.mxu0 %v3089_v47 }
 0x168   : > { %2217 = vmatmul.mubr.f32.vlgmr.msra.gmra.mxu1 %v1308_v50 }
 0x169   : > { %2233 = vmatpush3.msra.mxu1 %v1258_v62  ;;  %2219 = vmatprep.mubr.f32.mxu1 %v1318_v1  ;;  %v1204_v3 = vpop.permute.xlu0 %1203 }
 0x16a   : > { %2234 = vmatprep.subr.mxu1 %v1261_v49  ;;  %2227 = vmatmul.mubr.f32.vlgmr.msra.gmra.mxu0 %v3122_v34 }
 0x16b   : > { %2235 = vmatpush3.msra.mxu1 %v1261_v49  ;;  %2229 = vmatprep.mubr.f32.mxu0 %v3124_v55 }
 0x16c   : > { %2220 = vmatmul.mubr.f32.gmra.mxu1 %v1328_v60 }
 0x16d   : > { %2236 = vmatprep.mubr.f32.mxu1 %v3089_v47 }
 0x16e   : > { %2230 = vmatmul.mubr.f32.gmra.mxu0 %v3130_v57 }
 0x170   : > { %2237 = vmatmul.mubr.f32.vlgmr.msra.gmra.mxu1 %v3122_v34 }
 0x171   : > { %2239 = vmatprep.mubr.f32.mxu1 %v3124_v55 }
 0x174   : > { %2240 = vmatmul.mubr.f32.gmra.mxu1 %v3130_v57 }
 0x217   : > { %v2188_v41 = vpop.f32.mrf.mxu0 }
 0x218   : > { %v1313_v9 = vadd.f32 %v2188_v41, %v1204_v3 }
 0x219   : > { %v1302_v40 = vpop.f32.mrf.mxu0 }
 0x21a   : > { %v1303_v11 = vadd.f32 %v1302_v40, %v1199_v24 }
 0x21b   : > { %v2191_v45 = vpop.f32.mrf.mxu0 }
 0x21c   : > { %v1333_v16 = vadd.f32 %v2191_v45, %v1214_v8 }
 0x21d   : > { %v1322_v38 = vpop.f32.mrf.mxu0 }
 0x21e   : > { %v1323_v48 = vadd.f32 %v1322_v38, %v1209_v59 }
 0x21f   : > { %v2198_v0 = vpop.f32.mrf.mxu1  ;;  %v2208_v4 = vpop.f32.mrf.mxu0 }
 0x220   : > { %v1420_v15 = vadd.f32 %v2198_v0, %v1313_v9 }
 0x221   : > { %v1413_v5 = vpop.f32.mrf.mxu1  ;;  %v1507_v47 = vpop.f32.mrf.mxu0 }
 0x222   : > { %v1414_v55 = vadd.f32 %v1413_v5, %v1303_v11  ;;  %v1515_v6 = vadd.f32 %v2208_v4, %v1420_v15 }
 0x224   : > { %v2201_v10 = vpop.f32.mrf.mxu1  ;;  %v1508_v28 = vadd.f32 %v1507_v47, %v1414_v55 }
 0x225   : > { %v1432_v21 = vadd.f32 %v2201_v10, %v1333_v16 }
 0x226   : > { %v1425_v34 = vpop.f32.mrf.mxu1  ;;  %v2211_v17 = vpop.f32.mrf.mxu0 }
 0x227   : > { %v1426_v46 = vadd.f32 %v1425_v34, %v1323_v48  ;;  %v1529_v19 = vadd.f32 %v2211_v17, %v1432_v21 }
 0x228   : > { %v1521_v22 = vpop.f32.mrf.mxu0  ;;  %v2218_v42 = vpop.f32.mrf.mxu1 }
 0x229   : > { %v1612_v14 = vadd.f32 %v2218_v42, %v1515_v6  ;;  %v1522_v54 = vadd.f32 %v1521_v22, %v1426_v46 }
 0x22a   : > { %v1603_v43 = vpop.f32.mrf.mxu1  ;;  %v2228_v32 = vpop.f32.mrf.mxu0 }
 0x22b   : > { %v1604_v53 = vadd.f32 %v1603_v43, %v1508_v28  ;;  %v1711_v58 = vadd.f32 %v2228_v32, %v1612_v14 }
 0x22c   : > { %v2221_v57 = vpop.f32.mrf.mxu1  ;;  %v1704_v26 = vpop.f32.mrf.mxu0 }
 0x22d   : > { %v1628_v51 = vadd.f32 %v2221_v57, %v1529_v19  ;;  %v1705_v50 = vadd.f32 %v1704_v26, %v1604_v53 }
 0x22e   : > { %v1619_v13 = vpop.f32.mrf.mxu1  ;;  %v2231_v36 = vpop.f32.mrf.mxu0 }
 0x22f   : > { %v1620_v20 = vadd.f32 %v1619_v13, %v1522_v54  ;;  %v1723_v49 = vadd.f32 %v2231_v36, %v1628_v51 }
 0x230   : > { %v2238_v63 = vpop.f32.mrf.mxu1  ;;  %v1716_v1 = vpop.f32.mrf.mxu0 }
 0x231   : > { %v1802_v12 = vadd.f32 %v2238_v63, %v1711_v58  ;;  %v1717_v56 = vadd.f32 %v1716_v1, %v1620_v20 }
 0x232   : > { %v1795_v52 = vpop.f32.mrf.mxu1 }
 0x233   : > { %1819 = vst.msk [vmem:[%s233_s14 + $0x8] sm:$0xff] %vm1817_vm1, %v1802_v12  ;;  %v1796_v30 = vadd.f32 %v1795_v52, %v1705_v50 }
 0x234   : > { %v2241_v2 = vpop.f32.mrf.mxu1 }
 0x235   : > { %1818 = vst.msk [vmem:[%s233_s14] sm:$0xff] %vm1817_vm1, %v1796_v30  ;;  %v1814_v37 = vadd.f32 %v2241_v2, %v1723_v49 }
 0x236   : > { %v1807_v60 = vpop.f32.mrf.mxu1 }
 0x237   : > { %1821 = vst.msk [vmem:[%s233_s14 + $0x18] sm:$0xff] %vm1817_vm1, %v1814_v37  ;;  %v1808_v33 = vadd.f32 %v1807_v60, %v1717_v56 }
 0x239   : > { %1820 = vst.msk [vmem:[%s233_s14 + $0x10] sm:$0xff] %vm1817_vm1, %v1808_v33 }
 0x23a PF: > { %s14_s17 = sadd.s32 1, %s2291_s17   ;;  %s3360_s15 = smov %s2287_s16 }
 0x23b   : > { %p11_p5 = scmp.ge.s32.totalorder %s14_s17, 4   ;;  %s3361_s16 = smov %s3363_s18 }
 0x23d   :  { %13 = sbr.rel (!%p11_p5) target bundleno = 2 (0x2), region = 66 }

</bundles_post_ra>
